<compile_context>
chip_gen: v7x
topology: tpu7x:2x2x1
jax: 0.10.0
libtpu: 0.0.40
codegen_flags: <defaults>
</compile_context>

<pallas_src>
import math
from functools import partial

import jax
import jax.numpy as jnp
from jax.experimental import pallas as pl
from jax.experimental.pallas import tpu as pltpu


def _layernorm_dense_kernel(x_ref, gamma_ref, beta_ref, o_ref, *, eps, d, tail_bf16):
    """d_model % 128 == 0: one logical row per kernel row, plain reductions."""
    x = x_ref[...].astype(jnp.float32)
    inv_d = 1.0 / d
    mean = jnp.sum(x, axis=-1, keepdims=True) * inv_d
    centered = x - mean
    var = jnp.sum(centered * centered, axis=-1, keepdims=True) * inv_d
    inv_std = jax.lax.rsqrt(var + eps)  # biased variance (unbiased=False)
    g = gamma_ref[...]
    b = beta_ref[...]
    if tail_bf16:
        scale = g.astype(jnp.bfloat16) * inv_std.astype(jnp.bfloat16)
        out = centered.astype(jnp.bfloat16) * scale + b.astype(jnp.bfloat16)
    else:
        out = centered * (g.astype(jnp.float32) * inv_std) + b.astype(jnp.float32)
    o_ref[...] = out.astype(o_ref.dtype)


def _layernorm_packed_kernel(x_ref, gamma_ref, beta_ref, seg_ref, bcast_ref, o_ref,
                             *, eps, d, tail_bf16):
    """k logical rows packed per lane-dense kernel row; segmented stats on the MXU.

    seg_ref:   (w, k) static 0/1 matrix, w = k * d  -> segmented sums via matmul.
    bcast_ref: (k, w) its transpose                -> broadcast back via matmul.
    """
    x = x_ref[...].astype(jnp.float32)
    inv_d = 1.0 / d
    seg = seg_ref[...]
    bcast = bcast_ref[...]
    mean_seg = jnp.dot(x, seg, preferred_element_type=jnp.float32) * inv_d      # (t, k)
    mean = jnp.dot(mean_seg, bcast, preferred_element_type=jnp.float32)         # (t, w)
    centered = x - mean
    var_seg = jnp.dot(centered * centered, seg,
                      preferred_element_type=jnp.float32) * inv_d               # (t, k)
    inv_std_seg = jax.lax.rsqrt(var_seg + eps)       # rsqrt on the narrow array
    inv_std = jnp.dot(inv_std_seg, bcast, preferred_element_type=jnp.float32)   # (t, w)
    g = gamma_ref[...]
    b = beta_ref[...]
    if tail_bf16:
        scale = g.astype(jnp.bfloat16) * inv_std.astype(jnp.bfloat16)
        out = centered.astype(jnp.bfloat16) * scale + b.astype(jnp.bfloat16)
    else:
        out = centered * (g.astype(jnp.float32) * inv_std) + b.astype(jnp.float32)
    o_ref[...] = out.astype(o_ref.dtype)


def _round_up(x, m):
    return ((x + m - 1) // m) * m


def _round_down(x, m):
    return (x // m) * m


def layer_norm(x, gamma, beta, eps=1e-12, *, block_rows=None, max_tile_rows=2048):
    """LayerNorm over the last axis of x (matches the PyTorch module)."""
    orig_shape = x.shape
    d_model = int(orig_shape[-1])
    x2 = x.reshape(-1, d_model)
    rows = int(x2.shape[0])

    # --- lane packing: always make kernel rows 128-lane dense -----------------
    # Pad the row count by at most (k-1) zero rows so packing always applies;
    # this keeps every output store a full (unmasked) `vst`.
    k = 1
    if d_model % 128 != 0:
        k = 128 // math.gcd(d_model, 128)
    rows_pad = _round_up(rows, k)
    if rows_pad != rows:
        x2 = jnp.concatenate(
            [x2, jnp.zeros((rows_pad - rows, d_model), x2.dtype)], axis=0)
    w = d_model * k                    # multiple of 128 by construction
    krows = rows_pad // k
    xk = x2.reshape(krows, w)          # contiguous reshape: no extra HBM pass

    gamma_w = jnp.tile(gamma.reshape(-1), (k,)).reshape(1, w)
    beta_w = jnp.tile(beta.reshape(-1), (k,)).reshape(1, w)

    # --- tile sizing (VMEM-aware, roofline-sized) ------------------------------
    itemsize = jnp.dtype(x.dtype).itemsize
    sub = {4: 8, 2: 16, 1: 32}.get(itemsize, 8)   # sublane multiple per dtype
    lane_w = _round_up(w, 128)

    vmem_limit = 32 * 1024 * 1024      # scoped request; fits v5e/v6e/v7x alike
    usable = vmem_limit // 2           # headroom for params / seg mats / scratch
    # Per tile-row VMEM: double-buffered (in + out) blocks plus ~4 f32 temps
    # (x32, mean, centered, scale/sq) that the kernel actually materializes.
    per_row = 4 * lane_w * itemsize + 4 * lane_w * 4
    max_block_bytes = 1 * 1024 * 1024  # ~HBM-roofline knee; bigger buys nothing

    if block_rows is None:
        tile = min(usable // per_row,
                   max_block_bytes // (lane_w * itemsize),
                   max_tile_rows)
    else:
        tile = int(block_rows)
    tile = max(sub, _round_down(tile, sub))

    # Give megacore (v7x: 2 TensorCores) at least ~8 grid steps when rows allow.
    min_steps = 8
    if block_rows is None and krows >= sub * min_steps:
        tile = min(tile, max(sub, _round_down(krows // min_steps, sub)))

    if tile >= krows:
        tile = krows                   # single full-extent block (always legal)
    vmem_limit = max(vmem_limit, 2 * tile * per_row)   # safety for huge d_model
    grid = (pl.cdiv(krows, tile),)     # ragged last block handled by Pallas

    # bf16 elementwise tail halves VALU work on v6e/v7x packed-bf16 VALUs.
    tail_bf16 = (x.dtype == jnp.bfloat16)

    x_spec = pl.BlockSpec((tile, w), lambda i: (i, 0))
    p_spec = pl.BlockSpec((1, w), lambda i: (0, 0))      # VMEM-resident params
    out_spec = pl.BlockSpec((tile, w), lambda i: (i, 0))

    cost = pl.CostEstimate(
        flops=8 * rows_pad * d_model,
        transcendentals=rows_pad,
        bytes_accessed=2 * rows_pad * d_model * itemsize,
    )

    if k == 1:
        kernel = partial(_layernorm_dense_kernel, eps=float(eps), d=d_model,
                         tail_bf16=tail_bf16)
        in_specs = [x_spec, p_spec, p_spec]
        args = (xk, gamma_w, beta_w)
    else:
        seg_ids = jnp.arange(w, dtype=jnp.int32) // d_model
        seg_mat = (seg_ids[:, None] == jnp.arange(k, dtype=jnp.int32)[None, :]
                   ).astype(jnp.float32)                 # (w, k)
        bcast_mat = seg_mat.T                            # (k, w)
        kernel = partial(_layernorm_packed_kernel, eps=float(eps), d=d_model,
                         tail_bf16=tail_bf16)
        in_specs = [x_spec, p_spec, p_spec,
                    pl.BlockSpec((w, k), lambda i: (0, 0)),
                    pl.BlockSpec((k, w), lambda i: (0, 0))]
        args = (xk, gamma_w, beta_w, seg_mat, bcast_mat)

    out = pl.pallas_call(
        kernel,
        out_shape=jax.ShapeDtypeStruct((krows, w), x.dtype),
        grid_spec=pltpu.PrefetchScalarGridSpec(
            num_scalar_prefetch=0,
            grid=grid,
            in_specs=in_specs,
            out_specs=out_spec,
        ),
        compiler_params=pltpu.CompilerParams(
            dimension_semantics=("parallel",),
            vmem_limit_bytes=int(vmem_limit),
        ),
        cost_estimate=cost,
    )(*args)

    out = out.reshape(rows_pad, d_model)
    if rows_pad != rows:
        out = out[:rows]
    return out.reshape(orig_shape)


if __name__ == "__main__":
    def reference(x, gamma, beta, eps):
        x = x.astype(jnp.float32)
        mean = x.mean(-1, keepdims=True)
        var = ((x - mean) ** 2).mean(-1, keepdims=True)
        return gamma * (x - mean) / jnp.sqrt(var + eps) + beta

    key = jax.random.PRNGKey(0)
    k0, k1, k2, k3, k4, k5, k6 = jax.random.split(key, 7)

    # Main config implied by the module: (batch, seq, d_model), lane-packed path.
    batch, seq, d_model = 2, 8, 32
    x = jax.random.normal(k0, (batch, seq, d_model), dtype=jnp.float32)
    gamma = jnp.ones((d_model,), dtype=jnp.float32)   # nn.Parameter(torch.ones)
    beta = jnp.zeros((d_model,), dtype=jnp.float32)   # nn.Parameter(torch.zeros)
    y = layer_norm(x, gamma, beta, eps=1e-12)
    jax.block_until_ready(y)
    assert jnp.allclose(y, reference(x, gamma, beta, 1e-12), atol=1e-5, rtol=1e-5)

    # Lane-dense d_model (k == 1 path), single full-extent block, affine params.
    x2 = jax.random.normal(k1, (3, 6, 256), dtype=jnp.float32)
    g2 = 1.0 + 0.1 * jax.random.normal(k2, (256,), dtype=jnp.float32)
    b2 = 0.1 * jax.random.normal(k3, (256,), dtype=jnp.float32)
    y2 = layer_norm(x2, g2, b2, eps=1e-12)
    assert jnp.allclose(y2, reference(x2, g2, b2, 1e-12), atol=1e-5, rtol=1e-5)

    # Multi-step grid with a ragged final block (small tile forced explicitly).
    x3 = jax.random.normal(k4, (4, 11, 128), dtype=jnp.float32)
    g3 = jnp.ones((128,), dtype=jnp.float32)
    b3 = jnp.zeros((128,), dtype=jnp.float32)
    y3 = layer_norm(x3, g3, b3, eps=1e-12, block_rows=16)
    assert jnp.allclose(y3, reference(x3, g3, b3, 1e-12), atol=1e-5, rtol=1e-5)

    # Row count not a multiple of the packing factor -> row padding + slice path.
    x4 = jax.random.normal(k5, (2, 5, 32), dtype=jnp.float32)
    y4 = layer_norm(x4, gamma, beta, eps=1e-12)
    assert jnp.allclose(y4, reference(x4, gamma, beta, 1e-12), atol=1e-5, rtol=1e-5)

    # Default multi-step grid (min_steps path) on a lane-dense shape.
    x5 = jax.random.normal(k6, (2, 256, 128), dtype=jnp.float32)
    y5 = layer_norm(x5, g3, b3, eps=1e-12)
    assert jnp.allclose(y5, reference(x5, g3, b3, 1e-12), atol=1e-5, rtol=1e-5)

    # bf16 input: f32 statistics, bf16 elementwise tail (loose tolerance).
    x6 = jax.random.normal(k1, (2, 8, 128), dtype=jnp.float32).astype(jnp.bfloat16)
    y6 = layer_norm(x6, g3, b3, eps=1e-12)
    ref6 = reference(x6.astype(jnp.float32), g3, b3, 1e-12)
    assert jnp.allclose(y6.astype(jnp.float32), ref6, atol=5e-2, rtol=5e-2)

    jax.block_until_ready((y2, y3, y4, y5, y6))
    print("KERNEL_OK")
</pallas_src>

<mosaic_0001>
module attributes {stable_mosaic.version = 11 : i64} {
  func.func @_layernorm_packed_kernel(%arg0: i32, %arg1: memref<4x128xf32, #tpu.memory_space<vmem>>, %arg2: memref<1x128xf32, #tpu.memory_space<vmem>>, %arg3: memref<1x128xf32, #tpu.memory_space<vmem>>, %arg4: memref<128x4xf32, #tpu.memory_space<vmem>>, %arg5: memref<4x128xf32, #tpu.memory_space<vmem>>, %arg6: memref<4x128xf32, #tpu.memory_space<vmem>>) attributes {dimension_semantics = [#tpu.dimension_semantics<parallel>], iteration_bounds = array<i64: 1>, scalar_prefetch = 0 : i64, scratch_operands = 0 : i64, tpu.core_type = #tpu.core_type<tc>, window_params = [{transform_indices = @transform_0, window_bounds = array<i64: 4, 128>}, {pipeline_mode = #tpu.pipeline_mode<synchronous>, transform_indices = @transform_1, window_bounds = array<i64: 1, 128>}, {pipeline_mode = #tpu.pipeline_mode<synchronous>, transform_indices = @transform_2, window_bounds = array<i64: 1, 128>}, {pipeline_mode = #tpu.pipeline_mode<synchronous>, transform_indices = @transform_3, window_bounds = array<i64: 128, 4>}, {pipeline_mode = #tpu.pipeline_mode<synchronous>, transform_indices = @transform_4, window_bounds = array<i64: 4, 128>}, {transform_indices = @transform_5, window_bounds = array<i64: 4, 128>}]} {
    %c0 = arith.constant 0 : index
    %c0_0 = arith.constant 0 : index
    %0 = vector.load %arg1[%c0, %c0_0] : memref<4x128xf32, #tpu.memory_space<vmem>>, vector<4x128xf32>
    %c0_1 = arith.constant 0 : index
    %c0_2 = arith.constant 0 : index
    %1 = vector.load %arg4[%c0_1, %c0_2] : memref<128x4xf32, #tpu.memory_space<vmem>>, vector<128x4xf32>
    %c0_3 = arith.constant 0 : index
    %c0_4 = arith.constant 0 : index
    %2 = vector.load %arg5[%c0_3, %c0_4] : memref<4x128xf32, #tpu.memory_space<vmem>>, vector<4x128xf32>
    %cst = arith.constant dense<0.000000e+00> : vector<4x4xf32>
    %3 = tpu.matmul %0, %1, %cst {dimension_numbers = #tpu.dot_dimension_numbers<[1], [0], [0], [1], [0, 0, 1, 1], [], []>} : vector<4x128xf32>, vector<128x4xf32>, vector<4x4xf32> -> vector<4x4xf32>
    %cst_5 = arith.constant 3.125000e-02 : f32
    %4 = vector.broadcast %cst_5 : f32 to vector<4x4xf32>
    %5 = arith.mulf %3, %4 : vector<4x4xf32>
    %cst_6 = arith.constant dense<0.000000e+00> : vector<4x128xf32>
    %6 = tpu.matmul %5, %2, %cst_6 {dimension_numbers = #tpu.dot_dimension_numbers<[1], [0], [0], [1], [0, 0, 1, 1], [], []>} : vector<4x4xf32>, vector<4x128xf32>, vector<4x128xf32> -> vector<4x128xf32>
    %7 = arith.subf %0, %6 : vector<4x128xf32>
    %8 = arith.mulf %7, %7 : vector<4x128xf32>
    %cst_7 = arith.constant dense<0.000000e+00> : vector<4x4xf32>
    %9 = tpu.matmul %8, %1, %cst_7 {dimension_numbers = #tpu.dot_dimension_numbers<[1], [0], [0], [1], [0, 0, 1, 1], [], []>} : vector<4x128xf32>, vector<128x4xf32>, vector<4x4xf32> -> vector<4x4xf32>
    %cst_8 = arith.constant 3.125000e-02 : f32
    %10 = vector.broadcast %cst_8 : f32 to vector<4x4xf32>
    %11 = arith.mulf %9, %10 : vector<4x4xf32>
    %cst_9 = arith.constant 9.99999996E-13 : f32
    %12 = vector.broadcast %cst_9 : f32 to vector<4x4xf32>
    %13 = arith.addf %11, %12 : vector<4x4xf32>
    %14 = math.rsqrt %13 : vector<4x4xf32>
    %cst_10 = arith.constant dense<0.000000e+00> : vector<4x128xf32>
    %15 = tpu.matmul %14, %2, %cst_10 {dimension_numbers = #tpu.dot_dimension_numbers<[1], [0], [0], [1], [0, 0, 1, 1], [], []>} : vector<4x4xf32>, vector<4x128xf32>, vector<4x128xf32> -> vector<4x128xf32>
    %c0_11 = arith.constant 0 : index
    %c0_12 = arith.constant 0 : index
    %16 = vector.load %arg2[%c0_11, %c0_12] : memref<1x128xf32, #tpu.memory_space<vmem>>, vector<1x128xf32>
    %c0_13 = arith.constant 0 : index
    %c0_14 = arith.constant 0 : index
    %17 = vector.load %arg3[%c0_13, %c0_14] : memref<1x128xf32, #tpu.memory_space<vmem>>, vector<1x128xf32>
    %18 = vector.broadcast %16 : vector<1x128xf32> to vector<4x128xf32>
    %19 = arith.mulf %18, %15 : vector<4x128xf32>
    %20 = arith.mulf %7, %19 : vector<4x128xf32>
    %21 = vector.broadcast %17 : vector<1x128xf32> to vector<4x128xf32>
    %22 = arith.addf %20, %21 : vector<4x128xf32>
    %c0_15 = arith.constant 0 : index
    %c0_16 = arith.constant 0 : index
    %23 = vector.load %arg6[%c0_15, %c0_16] : memref<4x128xf32, #tpu.memory_space<vmem>>, vector<4x128xf32>
    tpu.vector_store %arg6[%c0_15, %c0_16], %22 {strides = array<i32>} : memref<4x128xf32, #tpu.memory_space<vmem>>, vector<4x128xf32>,
    return
  }
  func.func @transform_0(%arg0: i32) -> (i32, i32) {
    %c0_i32 = arith.constant 0 : i32
    %c0_i32_0 = arith.constant 0 : i32
    return %arg0, %c0_i32 : i32, i32
  }
  func.func @transform_1(%arg0: i32) -> (i32, i32) {
    %c0_i32 = arith.constant 0 : i32
    %c0_i32_0 = arith.constant 0 : i32
    %c0_i32_1 = arith.constant 0 : i32
    return %c0_i32, %c0_i32_0 : i32, i32
  }
  func.func @transform_2(%arg0: i32) -> (i32, i32) {
    %c0_i32 = arith.constant 0 : i32
    %c0_i32_0 = arith.constant 0 : i32
    %c0_i32_1 = arith.constant 0 : i32
    return %c0_i32, %c0_i32_0 : i32, i32
  }
  func.func @transform_3(%arg0: i32) -> (i32, i32) {
    %c0_i32 = arith.constant 0 : i32
    %c0_i32_0 = arith.constant 0 : i32
    %c0_i32_1 = arith.constant 0 : i32
    return %c0_i32, %c0_i32_0 : i32, i32
  }
  func.func @transform_4(%arg0: i32) -> (i32, i32) {
    %c0_i32 = arith.constant 0 : i32
    %c0_i32_0 = arith.constant 0 : i32
    %c0_i32_1 = arith.constant 0 : i32
    return %c0_i32, %c0_i32_0 : i32, i32
  }
  func.func @transform_5(%arg0: i32) -> (i32, i32) {
    %c0_i32 = arith.constant 0 : i32
    %c0_i32_0 = arith.constant 0 : i32
    return %arg0, %c0_i32 : i32, i32
  }
}

</mosaic_0001>

<bundles_post_ra>
// kernel: tpu_custom_call.1
= control target key start
LH: loop header
LB: loop body
LE: loop exit
PB: predicated region body
PF: predicated region fallthrough
CT: control target
= control target key end

     0   :  { %v570_v3 = vmov 0.0|0.0   ;;  %vm571_vm0 = vmmov 0   ;;  %v572_v6 = vmov 0.0   ;;  %s698_s0 = inlined_call_operand.vmem [shape: f32[4,128], index: 0, kind: input, shape index: {}]   ;;  %s699_s1 = inlined_call_operand.vmem [shape: f32[1,128], index: 1, kind: input, shape index: {}]   ;;  %s700_s2 = inlined_call_operand.vmem [shape: f32[1,128], index: 2, kind: input, shape index: {}]   ;;  %s701_s3 = inlined_call_operand.vmem [shape: f32[128,4], index: 3, kind: input, shape index: {}]   ;;  %s702_s4 = inlined_call_operand.vmem [shape: f32[4,128], index: 4, kind: input, shape index: {}]   ;;  %s703_s5 = inlined_call_operand.hbm [shape: f32[4,128], index: 5, kind: output, shape index: {}]  }
   0x1   :  { %v22_v0 = vld [vmem:[%s701_s3] sm:$0xff]  ;;  %v23_v1 = vld [vmem:[%s701_s3 + $0x8] sm:$0xff]  ;;  %v24_v2 = vld [vmem:[%s701_s3 + $0x10] sm:$0xff]  ;;  %492 = vmatprep.subr.bf16.mxu0 %v570_v3  ;;  %444 = vmatprep.mubr.msk.f32.mxu0 %vm571_vm0, %v572_v6 }
   0x2   :  { %v493_v4 = vpack.c.bf16 %v23_v1, %v22_v0  ;;  %v25_v5 = vld [vmem:[%s701_s3 + $0x18] sm:$0xff]  ;;  %447 = vmatprep.subr.mxu1 %v572_v6  ;;  %449 = vmatprep.mubr.msk.f32.mxu1 %vm571_vm0, %v572_v6  ;;  %v26_v8 = vld [vmem:[%s701_s3 + $0x20] sm:$0xff]  ;;  %v27_v9 = vld [vmem:[%s701_s3 + $0x28] sm:$0xff] }
   0x3   :  { %v496_v7 = vpack.c.bf16 %v25_v5, %v24_v2 }
   0x4   :  { %494 = vmatpush3.bf16.msra.mxu0 %v493_v4 }
   0x5   :  { %495 = vmatprep.subr.bf16.mxu0 %v570_v3 }
   0x6   :  { %10 = vsyncpa [#allocation3], 0  ;;  %v499_v10 = vpack.c.bf16 %v27_v9, %v26_v8  ;;  %v28_v11 = vld [vmem:[%s701_s3 + $0x30] sm:$0xff]  ;;  %v29_v12 = vld [vmem:[%s701_s3 + $0x38] sm:$0xff]  ;;  %vm114_vm1 = vcmask 1043456   ;;  %vm110_vm2 = vcmask 31744  }
   0x7   :  { %v502_v13 = vpack.c.bf16 %v29_v12, %v28_v11  ;;  %v30_v14 = vld [vmem:[%s701_s3 + $0x40] sm:$0xff]  ;;  %v31_v15 = vld [vmem:[%s701_s3 + $0x48] sm:$0xff]  ;;  %v32_v17 = vld [vmem:[%s701_s3 + $0x50] sm:$0xff]  ;;  %s573_s30 = smov [#allocation2]  }
   0x8   :  { %497 = vmatpush3.bf16.msra.mxu0 %v496_v7  ;;  %v505_v16 = vpack.c.bf16 %v31_v15, %v30_v14  ;;  %v33_v18 = vld [vmem:[%s701_s3 + $0x58] sm:$0xff]  ;;  %v34_v20 = vld [vmem:[%s701_s3 + $0x60] sm:$0xff]  ;;  %v35_v21 = vld [vmem:[%s701_s3 + $0x68] sm:$0xff]  ;;  %s360_s6 = sshll.u32 %s573_s30, 4  ;;  %s361_s6 = int_to_ptr.vmem [resolvable:$true] %s360_s6 }
   0x9   :  { %498 = vmatprep.subr.bf16.mxu0 %v570_v3  ;;  %v508_v19 = vpack.c.bf16 %v33_v18, %v32_v17  ;;  %v511_v22 = vpack.c.bf16 %v35_v21, %v34_v20  ;;  %v36_v23 = vld [vmem:[%s701_s3 + $0x70] sm:$0xff]  ;;  %v37_v24 = vld [vmem:[%s701_s3 + $0x78] sm:$0xff]  ;;  %v21_v26 = vld [vmem:[%s698_s0] sm:$0xf]  ;;  %s546_s7 = scalar_lea.vmem %s361_s6, 64  ;;  %p551_p1 = scmp.lt.s32.totalorder %s361_s6, %s361_s6 }
   0xa   :  { %v514_v25 = vpack.c.bf16 %v37_v24, %v36_v23  ;;  %v38_v27 = vld [vmem:[%s702_s4] sm:$0xf]  ;;  %p547_p0 = scmp.ne.s32.totalorder %s361_s6, %s546_s7  ;;  %p552_p2 = scmp.lt.s32.totalorder %s546_s7, %s546_s7 }
   0xb   :  { %448 = vmatpush3.msk.msra.mxu1 %vm114_vm1, %v38_v27  ;;  %v372_v40 = vld [vmem:[%s699_s1] ss:$0 sm:$0xff] }
   0xc   :  { %500 = vmatpush3.bf16.msra.mxu0 %v499_v10  ;;  %516 = vmatprep.subr.bf16.mxu1 %v570_v3  ;;  %v373_v44 = vld [vmem:[%s700_s2] ss:$0 sm:$0xff]  ;;  %p553_p3 = por %p552_p2, %p551_p1 }
   0xd   :  { %501 = vmatprep.subr.bf16.mxu0 %v570_v3 }
   0xe   :  { %p554_p4 = pnand %p553_p3, %p547_p0 }
  0x10   :  { %503 = vmatpush3.bf16.msra.mxu0 %v502_v13 }
  0x11   :  { %504 = vmatprep.subr.bf16.mxu0 %v570_v3 }
  0x14   :  { %506 = vmatpush3.bf16.msra.mxu0 %v505_v16 }
  0x15   :  { %507 = vmatprep.subr.bf16.mxu0 %v570_v3 }
  0x18   :  { %509 = vmatpush3.bf16.msra.mxu0 %v508_v19 }
  0x19   :  { %510 = vmatprep.subr.bf16.mxu0 %v570_v3 }
  0x1c   :  { %512 = vmatpush3.bf16.msra.mxu0 %v511_v22 }
  0x1d   :  { %513 = vmatprep.subr.bf16.mxu0 %v570_v3 }
  0x20   :  { %515 = vmatpush3.bf16.msra.mxu0 %v514_v25 }
  0x21   :  { %487 = vmatprep.subr.mxu0 %v572_v6 }
  0x23   :  { %445 = vmatmul.mubr.f32.vlgmr.msra.gmra.mrb[0].mxu0 %v21_v26 }
  0x24   :  { %489 = vmatprep.mubr.msk.f32.mxu0 %vm571_vm0, %v572_v6  ;;  %488 = vmatpush3.msk.msra.mxu0 %vm114_vm1, %v38_v27 }
  0xf6   :  { %v105_v28 = vpop.f32.mrb[0].mxu0 }
  0xf7   :  { %v109_v29 = vmul.f32 0.03125, %v105_v28  ;;  %v446_v30 = vpop.f32.mrb[1].mxu0 }
  0xf9   :  { %450 = vmatmul.mubr.msk.f32.vlgmr.msra.gmra.mrb[0].mxu1 %vm110_vm2, %v109_v29 }
  0xfa   :  { %518 = vmatpush3.bf16.msra.mxu1 %v493_v4  ;;  %484 = vmatprep.mubr.msk.f32.mxu1 %vm571_vm0, %v572_v6 }
  0xfb   :  { %519 = vmatprep.subr.bf16.mxu1 %v570_v3 }
  0xfe   :  { %521 = vmatpush3.bf16.msra.mxu1 %v496_v7 }
  0xff   :  { %522 = vmatprep.subr.bf16.mxu1 %v570_v3 }
 0x102   :  { %524 = vmatpush3.bf16.msra.mxu1 %v499_v10 }
 0x103   :  { %525 = vmatprep.subr.bf16.mxu1 %v570_v3 }
 0x106   :  { %527 = vmatpush3.bf16.msra.mxu1 %v502_v13 }
 0x107   :  { %528 = vmatprep.subr.bf16.mxu1 %v570_v3 }
 0x10a   :  { %530 = vmatpush3.bf16.msra.mxu1 %v505_v16 }
 0x10b   :  { %531 = vmatprep.subr.bf16.mxu1 %v570_v3 }
 0x10e   :  { %533 = vmatpush3.bf16.msra.mxu1 %v508_v19 }
 0x10f   :  { %534 = vmatprep.subr.bf16.mxu1 %v570_v3 }
 0x112   :  { %536 = vmatpush3.bf16.msra.mxu1 %v511_v22 }
 0x113   :  { %537 = vmatprep.subr.bf16.mxu1 %v570_v3 }
 0x116   :  { %539 = vmatpush3.bf16.msra.mxu1 %v514_v25 }
 0x1cc   :  { %v184_v31 = vpop.f32.mrb[0].mxu1 }
 0x1cd   :  { %v188_v32 = vsub.f32 %v21_v26, %v184_v31  ;;  %v451_v33 = vpop.f32.mrb[1].mxu1 }
 0x1cf   :  { %v189_v34 = vmul.f32 %v188_v32, %v188_v32 }
 0x1d1   :  { %485 = vmatmul.mubr.f32.vlgmr.msra.gmra.mrb[2].mxu1 %v189_v34 }
 0x2a4   :  { %v256_v35 = vpop.f32.mrb[2].mxu1 }
 0x2a5   :  { %v260_v36 = vmul.f32 0.03125, %v256_v35  ;;  %v486_v37 = vpop.f32.mrb[3].mxu1 }
 0x2a7   :  { %v261_v38 = vadd.f32 1e-12, %v260_v36 }
 0x2a9   :  { %544 = vrsqrt.f32 %v261_v38 }
 0x2b3   :  { %v545_v39 = vpop.eup %544 }
 0x2b4   :  { %490 = vmatmul.mubr.msk.f32.vlgmr.msra.gmra.mrb[2].mxu0 %vm110_vm2, %v545_v39 }
 0x387   :  { %v332_v41 = vpop.f32.mrb[2].mxu0 }
 0x388   :  { %v344_v42 = vmul.f32 %v372_v40, %v332_v41  ;;  %v491_v43 = vpop.f32.mrb[3].mxu0 }
 0x38a   :  { %v345_v45 = vmul.f32 %v344_v42, %v188_v32 }
 0x38c   :  { %v352_v46 = vadd.f32 %v373_v44, %v345_v45 }
 0x38e   :  { %353 = vst [vmem:[#allocation2] sm:$0xf] %v352_v46 }
 0x38f   :  { %557 = shalt.err (!%p554_p4)
}
 0x390   :  { %s558_s9 = scalar_lea.hbm %s703_s5, 64 }
 0x391   :  { %p559_p5 = scmp.ne.s32.totalorder %s703_s5, %s558_s9  ;;  %p562_p6 = scmp.lt.u32.totalorder %s558_s9, %s703_s5 }
 0x393   :  { %p564_p7 = pnand %p562_p6, %p559_p5 }
 0x395   :  { %567 = shalt.err (!%p564_p7)
}
 0x396   :  { %363 = dma.vmem_to_hbm [thread:$0]  %s361_s6, 64, %s703_s5, [#allocation3]  }
 0x397   :  { %568 = dma.done.wait [#allocation3], 64  }
 0x398   :  { %569 = vsyncadd [#allocation3], 4294967232 }
 0x399   :  { %367 = vsyncpa [#allocation3], 1 }

</bundles_post_ra>
